<compile_context>
chip_gen: v5e
topology: v5e:2x2
jax: 0.10.0
libtpu: 0.0.40
codegen_flags: <defaults>
</compile_context>

<pallas_src>
import jax
import jax.numpy as jnp
import numpy as np
from jax.experimental import pallas as pl
from jax.experimental.pallas import tpu as pltpu


def make_residual_ae_kernel(n_blocks, n_enc, n_dec):
    """Flat ref order: x, [ (We,be)*n_enc, (Wd,bd)*n_dec ] * n_blocks,
       (Wt0,bt0,Wt1,bt1), out, latents."""

    def kernel(*refs):
        idx = 0
        x_ref = refs[idx]; idx += 1
        blocks = []
        for _ in range(n_blocks):
            enc = [(refs[idx + 2 * i], refs[idx + 2 * i + 1]) for i in range(n_enc)]
            idx += 2 * n_enc
            dec = [(refs[idx + 2 * i], refs[idx + 2 * i + 1]) for i in range(n_dec)]
            idx += 2 * n_dec
            blocks.append((enc, dec))
        trans = [(refs[idx], refs[idx + 1]), (refs[idx + 2], refs[idx + 3])]
        idx += 4
        out_ref, lat_ref = refs[idx], refs[idx + 1]

        def linear(h, w_ref, b_ref):
            # bf16 operands on the MXU (native input width on v5e/v6e/v7x),
            # f32 accumulation, f32 bias add on the VPU.
            return jnp.dot(h.astype(jnp.bfloat16),
                           w_ref[...].astype(jnp.bfloat16),
                           preferred_element_type=jnp.float32) + b_ref[...]

        def run_block(h, enc, dec):
            # encoder: Linear + LeakyReLU(0.01) on all but last layer
            for li, (w, b) in enumerate(enc):
                h = linear(h, w, b)
                if li < len(enc) - 1:
                    h = jnp.where(h >= 0, h, 0.01 * h)
                # TODO(synk): training-mode Dropout(p=0.5) omitted; eval-mode identity.
            latent = h
            # decoder: Linear + ReLU on all but last layer
            for li, (w, b) in enumerate(dec):
                h = linear(h, w, b)
                if li < len(dec) - 1:
                    h = jnp.maximum(h, 0.0)
            return latent, h

        x_in = x_ref[...].astype(jnp.float32)
        lats = []

        # ---- peeled first block (x_out == 0, so x_in += x_out is a no-op) ----
        enc0, dec0 = blocks[0]
        latent, x_out = run_block(x_in, enc0, dec0)
        lats.append(latent)

        # ---- remaining residual blocks ----
        for enc, dec in blocks[1:]:
            x_in = x_in + x_out
            latent, x_out = run_block(x_in, enc, dec)
            lats.append(latent)

        # single lane-contiguous latent store (no per-block masked column writes)
        lat_ref[...] = jnp.concatenate(lats, axis=-1).astype(lat_ref.dtype)

        # ---- transition: Linear -> ReLU -> Linear on (x_in + x_out) ----
        t = x_in + x_out
        (w0, b0), (w1, b1) = trans
        t = jnp.maximum(linear(t, w0, b0), 0.0)
        t = linear(t, w1, b1)
        out_ref[...] = t.astype(out_ref.dtype)

    return kernel


def residual_ae_forward(x, params, *, batch_tile=None):
    """Batch-gridded pallas_call; weights stay VMEM-resident across grid steps."""
    blocks = params["blocks"]
    n_enc = len(blocks[0]["enc"])
    n_dec = len(blocks[0]["dec"])

    weights = []
    for blk in blocks:
        for w, b in blk["enc"]:
            weights += [w, b]
        for w, b in blk["dec"]:
            weights += [w, b]
    for w, b in params["transition"]:
        weights += [w, b]

    B, D = x.shape
    latent_dim = blocks[0]["enc"][-1][0].shape[-1]
    total_lat = latent_dim * len(blocks)

    # Batch tile: multiple of 8 sublanes; cap at 128 (v5e MXU height) and at B.
    # Re-derive against the halved (64 MiB) VMEM on v7x if D/layers ever grow.
    if batch_tile is None:
        batch_tile = min(B, 128)
    TB = batch_tile
    assert B % TB == 0 and TB % 8 == 0, "B must be divisible by TB, TB by 8"
    grid = (B // TB,)

    # x / outputs tiled along the batch axis; last dims equal full array dims so
    # the (8,128) constraint is waived at these small feature widths.
    x_spec = pl.BlockSpec((TB, D), lambda i: (i, 0))
    # Weights/biases: full-array block, constant index_map -> VMEM-resident.
    w_specs = [pl.BlockSpec(w.shape, lambda i: (0, 0)) for w in weights]
    out_specs = (
        pl.BlockSpec((TB, D), lambda i: (i, 0)),
        pl.BlockSpec((TB, total_lat), lambda i: (i, 0)),
    )

    # Advisory cost hint: 2*B*sum(din*dout) matmul flops; all bytes touched once.
    matmul_flops = 0
    for w in weights[0::2]:
        matmul_flops += 2 * B * w.shape[0] * w.shape[1]
    bytes_accessed = (
        x.size * x.dtype.itemsize
        + sum(w.size * w.dtype.itemsize for w in weights)
        + B * D * x.dtype.itemsize
        + B * total_lat * x.dtype.itemsize
    )
    cost = pl.CostEstimate(flops=matmul_flops, transcendentals=0,
                           bytes_accessed=bytes_accessed)

    kernel = make_residual_ae_kernel(len(blocks), n_enc, n_dec)
    out, lat = pl.pallas_call(
        kernel,
        grid=grid,
        in_specs=[x_spec] + w_specs,
        out_specs=out_specs,
        out_shape=(
            jax.ShapeDtypeStruct((B, D), x.dtype),
            jax.ShapeDtypeStruct((B, total_lat), x.dtype),
        ),
        compiler_params=pltpu.CompilerParams(
            dimension_semantics=("parallel",),       # megacore sharding on v7x
            vmem_limit_bytes=32 * 1024 * 1024,       # safe on v5e/v6e/v7x
        ),
        cost_estimate=cost,
    )(x, *weights)
    return out, lat


# ---------------- deterministic parameter construction ----------------

def init_linear(key, din, dout, scale=0.1):
    kw, kb = jax.random.split(key)
    w = jax.random.normal(kw, (din, dout), jnp.float32) * scale
    b = jax.random.normal(kb, (1, dout), jnp.float32) * scale
    return w, b


def build_params(key, layers, n_blocks, input_dim):
    enc_dims = [input_dim] + list(layers)                 # D -> l0 -> l1 -> l2
    dec_dims = list(reversed(layers)) + [input_dim]       # l2 -> l1 -> l0 -> D
    params = {"blocks": [], "transition": []}
    for _ in range(n_blocks):
        enc, dec = [], []
        for i in range(len(enc_dims) - 1):
            key, sub = jax.random.split(key)
            enc.append(init_linear(sub, enc_dims[i], enc_dims[i + 1]))
        for i in range(len(dec_dims) - 1):
            key, sub = jax.random.split(key)
            dec.append(init_linear(sub, dec_dims[i], dec_dims[i + 1]))
        params["blocks"].append({"enc": enc, "dec": dec})
    for _ in range(2):
        key, sub = jax.random.split(key)
        params["transition"].append(init_linear(sub, input_dim, input_dim))
    return params


# ---------------- pure-JAX f32 reference (same math, for validation) ----------------

def ref_forward(x, params):
    x_in = x
    x_out = jnp.zeros_like(x)
    lats = []
    for blk in params["blocks"]:
        x_in = x_in + x_out
        h = x_in
        enc = blk["enc"]
        for i, (w, b) in enumerate(enc):
            h = h @ w + b
            if i < len(enc) - 1:
                h = jnp.where(h >= 0, h, 0.01 * h)
        lats.append(h)
        dec = blk["dec"]
        for i, (w, b) in enumerate(dec):
            h = h @ w + b
            if i < len(dec) - 1:
                h = jnp.maximum(h, 0.0)
        x_out = h
    (w0, b0), (w1, b1) = params["transition"]
    t = x_in + x_out
    t = jnp.maximum(t @ w0 + b0, 0.0) @ w1 + b1
    return t, jnp.concatenate(lats, axis=-1)


if __name__ == "__main__":
    B, input_dim = 32, 32          # B divisible by batch tile; small demo shapes
    layers = [64, 32, 16]
    n_blocks = 2
    TB = 8                         # 4 grid steps -> exercises batch pipelining

    key = jax.random.PRNGKey(0)
    key, kx, kp = jax.random.split(key, 3)
    x = jax.random.normal(kx, (B, input_dim), jnp.float32)
    params = build_params(kp, layers, n_blocks, input_dim)

    out, latents = residual_ae_forward(x, params, batch_tile=TB)
    out = jax.block_until_ready(out)
    latents = jax.block_until_ready(latents)

    ref_out, ref_lat = ref_forward(x, params)
    assert out.shape == (B, input_dim)
    assert latents.shape == (B, n_blocks * layers[-1])
    # bf16 MXU inputs vs f32 reference -> loose tolerances
    np.testing.assert_allclose(np.asarray(out), np.asarray(ref_out), rtol=5e-2, atol=5e-2)
    np.testing.assert_allclose(np.asarray(latents), np.asarray(ref_lat), rtol=5e-2, atol=5e-2)

    print("KERNEL_OK")
</pallas_src>

<mosaic_0001>
module attributes {stable_mosaic.version = 11 : i64} {
  func.func @kernel(%arg0: i32, %arg1: memref<8x32xf32, #tpu.memory_space<vmem>>, %arg2: memref<32x64xf32, #tpu.memory_space<vmem>>, %arg3: memref<1x64xf32, #tpu.memory_space<vmem>>, %arg4: memref<64x32xf32, #tpu.memory_space<vmem>>, %arg5: memref<1x32xf32, #tpu.memory_space<vmem>>, %arg6: memref<32x16xf32, #tpu.memory_space<vmem>>, %arg7: memref<1x16xf32, #tpu.memory_space<vmem>>, %arg8: memref<16x32xf32, #tpu.memory_space<vmem>>, %arg9: memref<1x32xf32, #tpu.memory_space<vmem>>, %arg10: memref<32x64xf32, #tpu.memory_space<vmem>>, %arg11: memref<1x64xf32, #tpu.memory_space<vmem>>, %arg12: memref<64x32xf32, #tpu.memory_space<vmem>>, %arg13: memref<1x32xf32, #tpu.memory_space<vmem>>, %arg14: memref<32x64xf32, #tpu.memory_space<vmem>>, %arg15: memref<1x64xf32, #tpu.memory_space<vmem>>, %arg16: memref<64x32xf32, #tpu.memory_space<vmem>>, %arg17: memref<1x32xf32, #tpu.memory_space<vmem>>, %arg18: memref<32x16xf32, #tpu.memory_space<vmem>>, %arg19: memref<1x16xf32, #tpu.memory_space<vmem>>, %arg20: memref<16x32xf32, #tpu.memory_space<vmem>>, %arg21: memref<1x32xf32, #tpu.memory_space<vmem>>, %arg22: memref<32x64xf32, #tpu.memory_space<vmem>>, %arg23: memref<1x64xf32, #tpu.memory_space<vmem>>, %arg24: memref<64x32xf32, #tpu.memory_space<vmem>>, %arg25: memref<1x32xf32, #tpu.memory_space<vmem>>, %arg26: memref<32x32xf32, #tpu.memory_space<vmem>>, %arg27: memref<1x32xf32, #tpu.memory_space<vmem>>, %arg28: memref<32x32xf32, #tpu.memory_space<vmem>>, %arg29: memref<1x32xf32, #tpu.memory_space<vmem>>, %arg30: memref<8x32xf32, #tpu.memory_space<vmem>>, %arg31: memref<8x32xf32, #tpu.memory_space<vmem>>) attributes {dimension_semantics = [#tpu.dimension_semantics<parallel>], iteration_bounds = array<i64: 4>, scalar_prefetch = 0 : i64, scratch_operands = 0 : i64, tpu.core_type = #tpu.core_type<tc>, window_params = [{transform_indices = @transform_0, window_bounds = array<i64: 8, 32>}, {pipeline_mode = #tpu.pipeline_mode<synchronous>, transform_indices = @transform_1, window_bounds = array<i64: 32, 64>}, {pipeline_mode = #tpu.pipeline_mode<synchronous>, transform_indices = @transform_2, window_bounds = array<i64: 1, 64>}, {pipeline_mode = #tpu.pipeline_mode<synchronous>, transform_indices = @transform_3, window_bounds = array<i64: 64, 32>}, {pipeline_mode = #tpu.pipeline_mode<synchronous>, transform_indices = @transform_4, window_bounds = array<i64: 1, 32>}, {pipeline_mode = #tpu.pipeline_mode<synchronous>, transform_indices = @transform_5, window_bounds = array<i64: 32, 16>}, {pipeline_mode = #tpu.pipeline_mode<synchronous>, transform_indices = @transform_6, window_bounds = array<i64: 1, 16>}, {pipeline_mode = #tpu.pipeline_mode<synchronous>, transform_indices = @transform_7, window_bounds = array<i64: 16, 32>}, {pipeline_mode = #tpu.pipeline_mode<synchronous>, transform_indices = @transform_8, window_bounds = array<i64: 1, 32>}, {pipeline_mode = #tpu.pipeline_mode<synchronous>, transform_indices = @transform_9, window_bounds = array<i64: 32, 64>}, {pipeline_mode = #tpu.pipeline_mode<synchronous>, transform_indices = @transform_10, window_bounds = array<i64: 1, 64>}, {pipeline_mode = #tpu.pipeline_mode<synchronous>, transform_indices = @transform_11, window_bounds = array<i64: 64, 32>}, {pipeline_mode = #tpu.pipeline_mode<synchronous>, transform_indices = @transform_12, window_bounds = array<i64: 1, 32>}, {pipeline_mode = #tpu.pipeline_mode<synchronous>, transform_indices = @transform_13, window_bounds = array<i64: 32, 64>}, {pipeline_mode = #tpu.pipeline_mode<synchronous>, transform_indices = @transform_14, window_bounds = array<i64: 1, 64>}, {pipeline_mode = #tpu.pipeline_mode<synchronous>, transform_indices = @transform_15, window_bounds = array<i64: 64, 32>}, {pipeline_mode = #tpu.pipeline_mode<synchronous>, transform_indices = @transform_16, window_bounds = array<i64: 1, 32>}, {pipeline_mode = #tpu.pipeline_mode<synchronous>, transform_indices = @transform_17, window_bounds = array<i64: 32, 16>}, {pipeline_mode = #tpu.pipeline_mode<synchronous>, transform_indices = @transform_18, window_bounds = array<i64: 1, 16>}, {pipeline_mode = #tpu.pipeline_mode<synchronous>, transform_indices = @transform_19, window_bounds = array<i64: 16, 32>}, {pipeline_mode = #tpu.pipeline_mode<synchronous>, transform_indices = @transform_20, window_bounds = array<i64: 1, 32>}, {pipeline_mode = #tpu.pipeline_mode<synchronous>, transform_indices = @transform_21, window_bounds = array<i64: 32, 64>}, {pipeline_mode = #tpu.pipeline_mode<synchronous>, transform_indices = @transform_22, window_bounds = array<i64: 1, 64>}, {pipeline_mode = #tpu.pipeline_mode<synchronous>, transform_indices = @transform_23, window_bounds = array<i64: 64, 32>}, {pipeline_mode = #tpu.pipeline_mode<synchronous>, transform_indices = @transform_24, window_bounds = array<i64: 1, 32>}, {pipeline_mode = #tpu.pipeline_mode<synchronous>, transform_indices = @transform_25, window_bounds = array<i64: 32, 32>}, {pipeline_mode = #tpu.pipeline_mode<synchronous>, transform_indices = @transform_26, window_bounds = array<i64: 1, 32>}, {pipeline_mode = #tpu.pipeline_mode<synchronous>, transform_indices = @transform_27, window_bounds = array<i64: 32, 32>}, {pipeline_mode = #tpu.pipeline_mode<synchronous>, transform_indices = @transform_28, window_bounds = array<i64: 1, 32>}, {transform_indices = @transform_29, window_bounds = array<i64: 8, 32>}, {transform_indices = @transform_30, window_bounds = array<i64: 8, 32>}]} {
    %c0 = arith.constant 0 : index
    %c0_0 = arith.constant 0 : index
    %0 = vector.load %arg1[%c0, %c0_0] : memref<8x32xf32, #tpu.memory_space<vmem>>, vector<8x32xf32>
    %1 = arith.truncf %0 : vector<8x32xf32> to vector<8x32xbf16>
    %c0_1 = arith.constant 0 : index
    %c0_2 = arith.constant 0 : index
    %2 = vector.load %arg2[%c0_1, %c0_2] : memref<32x64xf32, #tpu.memory_space<vmem>>, vector<32x64xf32>
    %3 = arith.truncf %2 : vector<32x64xf32> to vector<32x64xbf16>
    %cst = arith.constant dense<0.000000e+00> : vector<8x64xf32>
    %4 = tpu.matmul %1, %3, %cst {dimension_numbers = #tpu.dot_dimension_numbers<[1], [0], [0], [1], [0, 0, 1, 1], [], []>} : vector<8x32xbf16>, vector<32x64xbf16>, vector<8x64xf32> -> vector<8x64xf32>
    %c0_3 = arith.constant 0 : index
    %c0_4 = arith.constant 0 : index
    %5 = vector.load %arg3[%c0_3, %c0_4] : memref<1x64xf32, #tpu.memory_space<vmem>>, vector<1x64xf32>
    %6 = vector.broadcast %5 : vector<1x64xf32> to vector<8x64xf32>
    %7 = arith.addf %4, %6 : vector<8x64xf32>
    %cst_5 = arith.constant 0.000000e+00 : f32
    %8 = vector.broadcast %cst_5 : f32 to vector<8x64xf32>
    %9 = arith.cmpf oge, %7, %8 : vector<8x64xf32>
    %cst_6 = arith.constant 0.00999999977 : f32
    %10 = vector.broadcast %cst_6 : f32 to vector<8x64xf32>
    %11 = arith.mulf %10, %7 : vector<8x64xf32>
    %12 = arith.select %9, %7, %11 : vector<8x64xi1>, vector<8x64xf32>
    %13 = arith.truncf %12 : vector<8x64xf32> to vector<8x64xbf16>
    %c0_7 = arith.constant 0 : index
    %c0_8 = arith.constant 0 : index
    %14 = vector.load %arg4[%c0_7, %c0_8] : memref<64x32xf32, #tpu.memory_space<vmem>>, vector<64x32xf32>
    %15 = arith.truncf %14 : vector<64x32xf32> to vector<64x32xbf16>
    %cst_9 = arith.constant dense<0.000000e+00> : vector<8x32xf32>
    %16 = tpu.matmul %13, %15, %cst_9 {dimension_numbers = #tpu.dot_dimension_numbers<[1], [0], [0], [1], [0, 0, 1, 1], [], []>} : vector<8x64xbf16>, vector<64x32xbf16>, vector<8x32xf32> -> vector<8x32xf32>
    %c0_10 = arith.constant 0 : index
    %c0_11 = arith.constant 0 : index
    %17 = vector.load %arg5[%c0_10, %c0_11] : memref<1x32xf32, #tpu.memory_space<vmem>>, vector<1x32xf32>
    %18 = vector.broadcast %17 : vector<1x32xf32> to vector<8x32xf32>
    %19 = arith.addf %16, %18 : vector<8x32xf32>
    %cst_12 = arith.constant 0.000000e+00 : f32
    %20 = vector.broadcast %cst_12 : f32 to vector<8x32xf32>
    %21 = arith.cmpf oge, %19, %20 : vector<8x32xf32>
    %cst_13 = arith.constant 0.00999999977 : f32
    %22 = vector.broadcast %cst_13 : f32 to vector<8x32xf32>
    %23 = arith.mulf %22, %19 : vector<8x32xf32>
    %24 = arith.select %21, %19, %23 : vector<8x32xi1>, vector<8x32xf32>
    %25 = arith.truncf %24 : vector<8x32xf32> to vector<8x32xbf16>
    %c0_14 = arith.constant 0 : index
    %c0_15 = arith.constant 0 : index
    %26 = vector.load %arg6[%c0_14, %c0_15] : memref<32x16xf32, #tpu.memory_space<vmem>>, vector<32x16xf32>
    %27 = arith.truncf %26 : vector<32x16xf32> to vector<32x16xbf16>
    %cst_16 = arith.constant dense<0.000000e+00> : vector<8x16xf32>
    %28 = tpu.matmul %25, %27, %cst_16 {dimension_numbers = #tpu.dot_dimension_numbers<[1], [0], [0], [1], [0, 0, 1, 1], [], []>} : vector<8x32xbf16>, vector<32x16xbf16>, vector<8x16xf32> -> vector<8x16xf32>
    %c0_17 = arith.constant 0 : index
    %c0_18 = arith.constant 0 : index
    %29 = vector.load %arg7[%c0_17, %c0_18] : memref<1x16xf32, #tpu.memory_space<vmem>>, vector<1x16xf32>
    %30 = vector.broadcast %29 : vector<1x16xf32> to vector<8x16xf32>
    %31 = arith.addf %28, %30 : vector<8x16xf32>
    %32 = arith.truncf %31 : vector<8x16xf32> to vector<8x16xbf16>
    %c0_19 = arith.constant 0 : index
    %c0_20 = arith.constant 0 : index
    %33 = vector.load %arg8[%c0_19, %c0_20] : memref<16x32xf32, #tpu.memory_space<vmem>>, vector<16x32xf32>
    %34 = arith.truncf %33 : vector<16x32xf32> to vector<16x32xbf16>
    %cst_21 = arith.constant dense<0.000000e+00> : vector<8x32xf32>
    %35 = tpu.matmul %32, %34, %cst_21 {dimension_numbers = #tpu.dot_dimension_numbers<[1], [0], [0], [1], [0, 0, 1, 1], [], []>} : vector<8x16xbf16>, vector<16x32xbf16>, vector<8x32xf32> -> vector<8x32xf32>
    %c0_22 = arith.constant 0 : index
    %c0_23 = arith.constant 0 : index
    %36 = vector.load %arg9[%c0_22, %c0_23] : memref<1x32xf32, #tpu.memory_space<vmem>>, vector<1x32xf32>
    %37 = vector.broadcast %36 : vector<1x32xf32> to vector<8x32xf32>
    %38 = arith.addf %35, %37 : vector<8x32xf32>
    %cst_24 = arith.constant 0.000000e+00 : f32
    %39 = vector.broadcast %cst_24 : f32 to vector<8x32xf32>
    %40 = arith.maximumf %38, %39 : vector<8x32xf32>
    %41 = arith.truncf %40 : vector<8x32xf32> to vector<8x32xbf16>
    %c0_25 = arith.constant 0 : index
    %c0_26 = arith.constant 0 : index
    %42 = vector.load %arg10[%c0_25, %c0_26] : memref<32x64xf32, #tpu.memory_space<vmem>>, vector<32x64xf32>
    %43 = arith.truncf %42 : vector<32x64xf32> to vector<32x64xbf16>
    %cst_27 = arith.constant dense<0.000000e+00> : vector<8x64xf32>
    %44 = tpu.matmul %41, %43, %cst_27 {dimension_numbers = #tpu.dot_dimension_numbers<[1], [0], [0], [1], [0, 0, 1, 1], [], []>} : vector<8x32xbf16>, vector<32x64xbf16>, vector<8x64xf32> -> vector<8x64xf32>
    %c0_28 = arith.constant 0 : index
    %c0_29 = arith.constant 0 : index
    %45 = vector.load %arg11[%c0_28, %c0_29] : memref<1x64xf32, #tpu.memory_space<vmem>>, vector<1x64xf32>
    %46 = vector.broadcast %45 : vector<1x64xf32> to vector<8x64xf32>
    %47 = arith.addf %44, %46 : vector<8x64xf32>
    %cst_30 = arith.constant 0.000000e+00 : f32
    %48 = vector.broadcast %cst_30 : f32 to vector<8x64xf32>
    %49 = arith.maximumf %47, %48 : vector<8x64xf32>
    %50 = arith.truncf %49 : vector<8x64xf32> to vector<8x64xbf16>
    %c0_31 = arith.constant 0 : index
    %c0_32 = arith.constant 0 : index
    %51 = vector.load %arg12[%c0_31, %c0_32] : memref<64x32xf32, #tpu.memory_space<vmem>>, vector<64x32xf32>
    %52 = arith.truncf %51 : vector<64x32xf32> to vector<64x32xbf16>
    %cst_33 = arith.constant dense<0.000000e+00> : vector<8x32xf32>
    %53 = tpu.matmul %50, %52, %cst_33 {dimension_numbers = #tpu.dot_dimension_numbers<[1], [0], [0], [1], [0, 0, 1, 1], [], []>} : vector<8x64xbf16>, vector<64x32xbf16>, vector<8x32xf32> -> vector<8x32xf32>
    %c0_34 = arith.constant 0 : index
    %c0_35 = arith.constant 0 : index
    %54 = vector.load %arg13[%c0_34, %c0_35] : memref<1x32xf32, #tpu.memory_space<vmem>>, vector<1x32xf32>
    %55 = vector.broadcast %54 : vector<1x32xf32> to vector<8x32xf32>
    %56 = arith.addf %53, %55 : vector<8x32xf32>
    %57 = arith.addf %0, %56 : vector<8x32xf32>
    %58 = arith.truncf %57 : vector<8x32xf32> to vector<8x32xbf16>
    %c0_36 = arith.constant 0 : index
    %c0_37 = arith.constant 0 : index
    %59 = vector.load %arg14[%c0_36, %c0_37] : memref<32x64xf32, #tpu.memory_space<vmem>>, vector<32x64xf32>
    %60 = arith.truncf %59 : vector<32x64xf32> to vector<32x64xbf16>
    %cst_38 = arith.constant dense<0.000000e+00> : vector<8x64xf32>
    %61 = tpu.matmul %58, %60, %cst_38 {dimension_numbers = #tpu.dot_dimension_numbers<[1], [0], [0], [1], [0, 0, 1, 1], [], []>} : vector<8x32xbf16>, vector<32x64xbf16>, vector<8x64xf32> -> vector<8x64xf32>
    %c0_39 = arith.constant 0 : index
    %c0_40 = arith.constant 0 : index
    %62 = vector.load %arg15[%c0_39, %c0_40] : memref<1x64xf32, #tpu.memory_space<vmem>>, vector<1x64xf32>
    %63 = vector.broadcast %62 : vector<1x64xf32> to vector<8x64xf32>
    %64 = arith.addf %61, %63 : vector<8x64xf32>
    %cst_41 = arith.constant 0.000000e+00 : f32
    %65 = vector.broadcast %cst_41 : f32 to vector<8x64xf32>
    %66 = arith.cmpf oge, %64, %65 : vector<8x64xf32>
    %cst_42 = arith.constant 0.00999999977 : f32
    %67 = vector.broadcast %cst_42 : f32 to vector<8x64xf32>
    %68 = arith.mulf %67, %64 : vector<8x64xf32>
    %69 = arith.select %66, %64, %68 : vector<8x64xi1>, vector<8x64xf32>
    %70 = arith.truncf %69 : vector<8x64xf32> to vector<8x64xbf16>
    %c0_43 = arith.constant 0 : index
    %c0_44 = arith.constant 0 : index
    %71 = vector.load %arg16[%c0_43, %c0_44] : memref<64x32xf32, #tpu.memory_space<vmem>>, vector<64x32xf32>
    %72 = arith.truncf %71 : vector<64x32xf32> to vector<64x32xbf16>
    %cst_45 = arith.constant dense<0.000000e+00> : vector<8x32xf32>
    %73 = tpu.matmul %70, %72, %cst_45 {dimension_numbers = #tpu.dot_dimension_numbers<[1], [0], [0], [1], [0, 0, 1, 1], [], []>} : vector<8x64xbf16>, vector<64x32xbf16>, vector<8x32xf32> -> vector<8x32xf32>
    %c0_46 = arith.constant 0 : index
    %c0_47 = arith.constant 0 : index
    %74 = vector.load %arg17[%c0_46, %c0_47] : memref<1x32xf32, #tpu.memory_space<vmem>>, vector<1x32xf32>
    %75 = vector.broadcast %74 : vector<1x32xf32> to vector<8x32xf32>
    %76 = arith.addf %73, %75 : vector<8x32xf32>
    %cst_48 = arith.constant 0.000000e+00 : f32
    %77 = vector.broadcast %cst_48 : f32 to vector<8x32xf32>
    %78 = arith.cmpf oge, %76, %77 : vector<8x32xf32>
    %cst_49 = arith.constant 0.00999999977 : f32
    %79 = vector.broadcast %cst_49 : f32 to vector<8x32xf32>
    %80 = arith.mulf %79, %76 : vector<8x32xf32>
    %81 = arith.select %78, %76, %80 : vector<8x32xi1>, vector<8x32xf32>
    %82 = arith.truncf %81 : vector<8x32xf32> to vector<8x32xbf16>
    %c0_50 = arith.constant 0 : index
    %c0_51 = arith.constant 0 : index
    %83 = vector.load %arg18[%c0_50, %c0_51] : memref<32x16xf32, #tpu.memory_space<vmem>>, vector<32x16xf32>
    %84 = arith.truncf %83 : vector<32x16xf32> to vector<32x16xbf16>
    %cst_52 = arith.constant dense<0.000000e+00> : vector<8x16xf32>
    %85 = tpu.matmul %82, %84, %cst_52 {dimension_numbers = #tpu.dot_dimension_numbers<[1], [0], [0], [1], [0, 0, 1, 1], [], []>} : vector<8x32xbf16>, vector<32x16xbf16>, vector<8x16xf32> -> vector<8x16xf32>
    %c0_53 = arith.constant 0 : index
    %c0_54 = arith.constant 0 : index
    %86 = vector.load %arg19[%c0_53, %c0_54] : memref<1x16xf32, #tpu.memory_space<vmem>>, vector<1x16xf32>
    %87 = vector.broadcast %86 : vector<1x16xf32> to vector<8x16xf32>
    %88 = arith.addf %85, %87 : vector<8x16xf32>
    %89 = arith.truncf %88 : vector<8x16xf32> to vector<8x16xbf16>
    %c0_55 = arith.constant 0 : index
    %c0_56 = arith.constant 0 : index
    %90 = vector.load %arg20[%c0_55, %c0_56] : memref<16x32xf32, #tpu.memory_space<vmem>>, vector<16x32xf32>
    %91 = arith.truncf %90 : vector<16x32xf32> to vector<16x32xbf16>
    %cst_57 = arith.constant dense<0.000000e+00> : vector<8x32xf32>
    %92 = tpu.matmul %89, %91, %cst_57 {dimension_numbers = #tpu.dot_dimension_numbers<[1], [0], [0], [1], [0, 0, 1, 1], [], []>} : vector<8x16xbf16>, vector<16x32xbf16>, vector<8x32xf32> -> vector<8x32xf32>
    %c0_58 = arith.constant 0 : index
    %c0_59 = arith.constant 0 : index
    %93 = vector.load %arg21[%c0_58, %c0_59] : memref<1x32xf32, #tpu.memory_space<vmem>>, vector<1x32xf32>
    %94 = vector.broadcast %93 : vector<1x32xf32> to vector<8x32xf32>
    %95 = arith.addf %92, %94 : vector<8x32xf32>
    %cst_60 = arith.constant 0.000000e+00 : f32
    %96 = vector.broadcast %cst_60 : f32 to vector<8x32xf32>
    %97 = arith.maximumf %95, %96 : vector<8x32xf32>
    %98 = arith.truncf %97 : vector<8x32xf32> to vector<8x32xbf16>
    %c0_61 = arith.constant 0 : index
    %c0_62 = arith.constant 0 : index
    %99 = vector.load %arg22[%c0_61, %c0_62] : memref<32x64xf32, #tpu.memory_space<vmem>>, vector<32x64xf32>
    %100 = arith.truncf %99 : vector<32x64xf32> to vector<32x64xbf16>
    %cst_63 = arith.constant dense<0.000000e+00> : vector<8x64xf32>
    %101 = tpu.matmul %98, %100, %cst_63 {dimension_numbers = #tpu.dot_dimension_numbers<[1], [0], [0], [1], [0, 0, 1, 1], [], []>} : vector<8x32xbf16>, vector<32x64xbf16>, vector<8x64xf32> -> vector<8x64xf32>
    %c0_64 = arith.constant 0 : index
    %c0_65 = arith.constant 0 : index
    %102 = vector.load %arg23[%c0_64, %c0_65] : memref<1x64xf32, #tpu.memory_space<vmem>>, vector<1x64xf32>
    %103 = vector.broadcast %102 : vector<1x64xf32> to vector<8x64xf32>
    %104 = arith.addf %101, %103 : vector<8x64xf32>
    %cst_66 = arith.constant 0.000000e+00 : f32
    %105 = vector.broadcast %cst_66 : f32 to vector<8x64xf32>
    %106 = arith.maximumf %104, %105 : vector<8x64xf32>
    %107 = arith.truncf %106 : vector<8x64xf32> to vector<8x64xbf16>
    %c0_67 = arith.constant 0 : index
    %c0_68 = arith.constant 0 : index
    %108 = vector.load %arg24[%c0_67, %c0_68] : memref<64x32xf32, #tpu.memory_space<vmem>>, vector<64x32xf32>
    %109 = arith.truncf %108 : vector<64x32xf32> to vector<64x32xbf16>
    %cst_69 = arith.constant dense<0.000000e+00> : vector<8x32xf32>
    %110 = tpu.matmul %107, %109, %cst_69 {dimension_numbers = #tpu.dot_dimension_numbers<[1], [0], [0], [1], [0, 0, 1, 1], [], []>} : vector<8x64xbf16>, vector<64x32xbf16>, vector<8x32xf32> -> vector<8x32xf32>
    %c0_70 = arith.constant 0 : index
    %c0_71 = arith.constant 0 : index
    %111 = vector.load %arg25[%c0_70, %c0_71] : memref<1x32xf32, #tpu.memory_space<vmem>>, vector<1x32xf32>
    %112 = vector.broadcast %111 : vector<1x32xf32> to vector<8x32xf32>
    %113 = arith.addf %110, %112 : vector<8x32xf32>
    %114 = tpu.concatenate %31, %88 in 1 : vector<8x16xf32>, vector<8x16xf32> -> vector<8x32xf32>
    %c0_72 = arith.constant 0 : index
    %c0_73 = arith.constant 0 : index
    %115 = vector.load %arg31[%c0_72, %c0_73] : memref<8x32xf32, #tpu.memory_space<vmem>>, vector<8x32xf32>
    tpu.vector_store %arg31[%c0_72, %c0_73], %114 {strides = array<i32>} : memref<8x32xf32, #tpu.memory_space<vmem>>, vector<8x32xf32>,
    %116 = arith.addf %57, %113 : vector<8x32xf32>
    %117 = arith.truncf %116 : vector<8x32xf32> to vector<8x32xbf16>
    %c0_74 = arith.constant 0 : index
    %c0_75 = arith.constant 0 : index
    %118 = vector.load %arg26[%c0_74, %c0_75] : memref<32x32xf32, #tpu.memory_space<vmem>>, vector<32x32xf32>
    %119 = arith.truncf %118 : vector<32x32xf32> to vector<32x32xbf16>
    %cst_76 = arith.constant dense<0.000000e+00> : vector<8x32xf32>
    %120 = tpu.matmul %117, %119, %cst_76 {dimension_numbers = #tpu.dot_dimension_numbers<[1], [0], [0], [1], [0, 0, 1, 1], [], []>} : vector<8x32xbf16>, vector<32x32xbf16>, vector<8x32xf32> -> vector<8x32xf32>
    %c0_77 = arith.constant 0 : index
    %c0_78 = arith.constant 0 : index
    %121 = vector.load %arg27[%c0_77, %c0_78] : memref<1x32xf32, #tpu.memory_space<vmem>>, vector<1x32xf32>
    %122 = vector.broadcast %121 : vector<1x32xf32> to vector<8x32xf32>
    %123 = arith.addf %120, %122 : vector<8x32xf32>
    %cst_79 = arith.constant 0.000000e+00 : f32
    %124 = vector.broadcast %cst_79 : f32 to vector<8x32xf32>
    %125 = arith.maximumf %123, %124 : vector<8x32xf32>
    %126 = arith.truncf %125 : vector<8x32xf32> to vector<8x32xbf16>
    %c0_80 = arith.constant 0 : index
    %c0_81 = arith.constant 0 : index
    %127 = vector.load %arg28[%c0_80, %c0_81] : memref<32x32xf32, #tpu.memory_space<vmem>>, vector<32x32xf32>
    %128 = arith.truncf %127 : vector<32x32xf32> to vector<32x32xbf16>
    %cst_82 = arith.constant dense<0.000000e+00> : vector<8x32xf32>
    %129 = tpu.matmul %126, %128, %cst_82 {dimension_numbers = #tpu.dot_dimension_numbers<[1], [0], [0], [1], [0, 0, 1, 1], [], []>} : vector<8x32xbf16>, vector<32x32xbf16>, vector<8x32xf32> -> vector<8x32xf32>
    %c0_83 = arith.constant 0 : index
    %c0_84 = arith.constant 0 : index
    %130 = vector.load %arg29[%c0_83, %c0_84] : memref<1x32xf32, #tpu.memory_space<vmem>>, vector<1x32xf32>
    %131 = vector.broadcast %130 : vector<1x32xf32> to vector<8x32xf32>
    %132 = arith.addf %129, %131 : vector<8x32xf32>
    %c0_85 = arith.constant 0 : index
    %c0_86 = arith.constant 0 : index
    %133 = vector.load %arg30[%c0_85, %c0_86] : memref<8x32xf32, #tpu.memory_space<vmem>>, vector<8x32xf32>
    tpu.vector_store %arg30[%c0_85, %c0_86], %132 {strides = array<i32>} : memref<8x32xf32, #tpu.memory_space<vmem>>, vector<8x32xf32>,
    return
  }
  func.func @transform_0(%arg0: i32) -> (i32, i32) {
    %c0_i32 = arith.constant 0 : i32
    %c0_i32_0 = arith.constant 0 : i32
    return %arg0, %c0_i32 : i32, i32
  }
  func.func @transform_1(%arg0: i32) -> (i32, i32) {
    %c0_i32 = arith.constant 0 : i32
    %c0_i32_0 = arith.constant 0 : i32
    %c0_i32_1 = arith.constant 0 : i32
    return %c0_i32, %c0_i32_0 : i32, i32
  }
  func.func @transform_2(%arg0: i32) -> (i32, i32) {
    %c0_i32 = arith.constant 0 : i32
    %c0_i32_0 = arith.constant 0 : i32
    %c0_i32_1 = arith.constant 0 : i32
    return %c0_i32, %c0_i32_0 : i32, i32
  }
  func.func @transform_3(%arg0: i32) -> (i32, i32) {
    %c0_i32 = arith.constant 0 : i32
    %c0_i32_0 = arith.constant 0 : i32
    %c0_i32_1 = arith.constant 0 : i32
    return %c0_i32, %c0_i32_0 : i32, i32
  }
  func.func @transform_4(%arg0: i32) -> (i32, i32) {
    %c0_i32 = arith.constant 0 : i32
    %c0_i32_0 = arith.constant 0 : i32
    %c0_i32_1 = arith.constant 0 : i32
    return %c0_i32, %c0_i32_0 : i32, i32
  }
  func.func @transform_5(%arg0: i32) -> (i32, i32) {
    %c0_i32 = arith.constant 0 : i32
    %c0_i32_0 = arith.constant 0 : i32
    %c0_i32_1 = arith.constant 0 : i32
    return %c0_i32, %c0_i32_0 : i32, i32
  }
  func.func @transform_6(%arg0: i32) -> (i32, i32) {
    %c0_i32 = arith.constant 0 : i32
    %c0_i32_0 = arith.constant 0 : i32
    %c0_i32_1 = arith.constant 0 : i32
    return %c0_i32, %c0_i32_0 : i32, i32
  }
  func.func @transform_7(%arg0: i32) -> (i32, i32) {
    %c0_i32 = arith.constant 0 : i32
    %c0_i32_0 = arith.constant 0 : i32
    %c0_i32_1 = arith.constant 0 : i32
    return %c0_i32, %c0_i32_0 : i32, i32
  }
  func.func @transform_8(%arg0: i32) -> (i32, i32) {
    %c0_i32 = arith.constant 0 : i32
    %c0_i32_0 = arith.constant 0 : i32
    %c0_i32_1 = arith.constant 0 : i32
    return %c0_i32, %c0_i32_0 : i32, i32
  }
  func.func @transform_9(%arg0: i32) -> (i32, i32) {
    %c0_i32 = arith.constant 0 : i32
    %c0_i32_0 = arith.constant 0 : i32
    %c0_i32_1 = arith.constant 0 : i32
    return %c0_i32, %c0_i32_0 : i32, i32
  }
  func.func @transform_10(%arg0: i32) -> (i32, i32) {
    %c0_i32 = arith.constant 0 : i32
    %c0_i32_0 = arith.constant 0 : i32
    %c0_i32_1 = arith.constant 0 : i32
    return %c0_i32, %c0_i32_0 : i32, i32
  }
  func.func @transform_11(%arg0: i32) -> (i32, i32) {
    %c0_i32 = arith.constant 0 : i32
    %c0_i32_0 = arith.constant 0 : i32
    %c0_i32_1 = arith.constant 0 : i32
    return %c0_i32, %c0_i32_0 : i32, i32
  }
  func.func @transform_12(%arg0: i32) -> (i32, i32) {
    %c0_i32 = arith.constant 0 : i32
    %c0_i32_0 = arith.constant 0 : i32
    %c0_i32_1 = arith.constant 0 : i32
    return %c0_i32, %c0_i32_0 : i32, i32
  }
  func.func @transform_13(%arg0: i32) -> (i32, i32) {
    %c0_i32 = arith.constant 0 : i32
    %c0_i32_0 = arith.constant 0 : i32
    %c0_i32_1 = arith.constant 0 : i32
    return %c0_i32, %c0_i32_0 : i32, i32
  }
  func.func @transform_14(%arg0: i32) -> (i32, i32) {
    %c0_i32 = arith.constant 0 : i32
    %c0_i32_0 = arith.constant 0 : i32
    %c0_i32_1 = arith.constant 0 : i32
    return %c0_i32, %c0_i32_0 : i32, i32
  }
  func.func @transform_15(%arg0: i32) -> (i32, i32) {
    %c0_i32 = arith.constant 0 : i32
    %c0_i32_0 = arith.constant 0 : i32
    %c0_i32_1 = arith.constant 0 : i32
    return %c0_i32, %c0_i32_0 : i32, i32
  }
  func.func @transform_16(%arg0: i32) -> (i32, i32) {
    %c0_i32 = arith.constant 0 : i32
    %c0_i32_0 = arith.constant 0 : i32
    %c0_i32_1 = arith.constant 0 : i32
    return %c0_i32, %c0_i32_0 : i32, i32
  }
  func.func @transform_17(%arg0: i32) -> (i32, i32) {
    %c0_i32 = arith.constant 0 : i32
    %c0_i32_0 = arith.constant 0 : i32
    %c0_i32_1 = arith.constant 0 : i32
    return %c0_i32, %c0_i32_0 : i32, i32
  }
  func.func @transform_18(%arg0: i32) -> (i32, i32) {
    %c0_i32 = arith.constant 0 : i32
    %c0_i32_0 = arith.constant 0 : i32
    %c0_i32_1 = arith.constant 0 : i32
    return %c0_i32, %c0_i32_0 : i32, i32
  }
  func.func @transform_19(%arg0: i32) -> (i32, i32) {
    %c0_i32 = arith.constant 0 : i32
    %c0_i32_0 = arith.constant 0 : i32
    %c0_i32_1 = arith.constant 0 : i32
    return %c0_i32, %c0_i32_0 : i32, i32
  }
  func.func @transform_20(%arg0: i32) -> (i32, i32) {
    %c0_i32 = arith.constant 0 : i32
    %c0_i32_0 = arith.constant 0 : i32
    %c0_i32_1 = arith.constant 0 : i32
    return %c0_i32, %c0_i32_0 : i32, i32
  }
  func.func @transform_21(%arg0: i32) -> (i32, i32) {
    %c0_i32 = arith.constant 0 : i32
    %c0_i32_0 = arith.constant 0 : i32
    %c0_i32_1 = arith.constant 0 : i32
    return %c0_i32, %c0_i32_0 : i32, i32
  }
  func.func @transform_22(%arg0: i32) -> (i32, i32) {
    %c0_i32 = arith.constant 0 : i32
    %c0_i32_0 = arith.constant 0 : i32
    %c0_i32_1 = arith.constant 0 : i32
    return %c0_i32, %c0_i32_0 : i32, i32
  }
  func.func @transform_23(%arg0: i32) -> (i32, i32) {
    %c0_i32 = arith.constant 0 : i32
    %c0_i32_0 = arith.constant 0 : i32
    %c0_i32_1 = arith.constant 0 : i32
    return %c0_i32, %c0_i32_0 : i32, i32
  }
  func.func @transform_24(%arg0: i32) -> (i32, i32) {
    %c0_i32 = arith.constant 0 : i32
    %c0_i32_0 = arith.constant 0 : i32
    %c0_i32_1 = arith.constant 0 : i32
    return %c0_i32, %c0_i32_0 : i32, i32
  }
  func.func @transform_25(%arg0: i32) -> (i32, i32) {
    %c0_i32 = arith.constant 0 : i32
    %c0_i32_0 = arith.constant 0 : i32
    %c0_i32_1 = arith.constant 0 : i32
    return %c0_i32, %c0_i32_0 : i32, i32
  }
  func.func @transform_26(%arg0: i32) -> (i32, i32) {
    %c0_i32 = arith.constant 0 : i32
    %c0_i32_0 = arith.constant 0 : i32
    %c0_i32_1 = arith.constant 0 : i32
    return %c0_i32, %c0_i32_0 : i32, i32
  }
  func.func @transform_27(%arg0: i32) -> (i32, i32) {
    %c0_i32 = arith.constant 0 : i32
    %c0_i32_0 = arith.constant 0 : i32
    %c0_i32_1 = arith.constant 0 : i32
    return %c0_i32, %c0_i32_0 : i32, i32
  }
  func.func @transform_28(%arg0: i32) -> (i32, i32) {
    %c0_i32 = arith.constant 0 : i32
    %c0_i32_0 = arith.constant 0 : i32
    %c0_i32_1 = arith.constant 0 : i32
    return %c0_i32, %c0_i32_0 : i32, i32
  }
  func.func @transform_29(%arg0: i32) -> (i32, i32) {
    %c0_i32 = arith.constant 0 : i32
    %c0_i32_0 = arith.constant 0 : i32
    return %arg0, %c0_i32 : i32, i32
  }
  func.func @transform_30(%arg0: i32) -> (i32, i32) {
    %c0_i32 = arith.constant 0 : i32
    %c0_i32_0 = arith.constant 0 : i32
    return %arg0, %c0_i32 : i32, i32
  }
}

</mosaic_0001>

<bundles_post_ra>
// kernel: tpu_custom_call.1
= control target key start
LH: loop header
LB: loop body
LE: loop exit
PB: predicated region body
PF: predicated region fallthrough
CT: control target
= control target key end

     0   :  { %s1733_s6 = smov 1   ;;  %s1734_s10 = smov 2   ;;  %s2135_s0 = inlined_call_operand.smem [shape: u32[31], index: -1, kind: input, shape index: {}] }
   0x1   :  { %s1772_s5 = sld [smem:[%s2135_s0]]   ;;  %s1735_s14 = smov 3  }
   0x2   :  { %s1777_s9 = sld [smem:[%s2135_s0 + %s1733_s6]]   ;;  %s1736_s18 = smov 4  }
   0x3   :  { %s1782_s13 = sld [smem:[%s2135_s0 + %s1734_s10]]   ;;  %s1737_s22 = smov 5  }
   0x4   :  { %s1787_s17 = sld [smem:[%s2135_s0 + %s1735_s14]]   ;;  %s1738_s26 = smov 6  }
   0x5   :  { %s1792_s21 = sld [smem:[%s2135_s0 + %s1736_s18]]   ;;  %s1739_s30 = smov 7  }
   0x6   :  { %s1797_s25 = sld [smem:[%s2135_s0 + %s1737_s22]]   ;;  %s1740_s4 = smov 8  }
   0x7   :  { %2151 = sst [smem:[#allocation8_spill]] %s1772_s5  ;;  %s1741_s10 = smov 9  }
   0x8   :  { %2152 = sst [smem:[#allocation9_spill]] %s1777_s9  ;;  %s1742_s15 = smov 10  }
   0x9   :  { %2153 = sst [smem:[#allocation10_spill]] %s1782_s13  ;;  %s1743_s20 = smov 11  }
   0xa   :  { %2154 = sst [smem:[#allocation11_spill]] %s1787_s17  ;;  %s1745_s1 = smov 13  }
   0xb   :  { %s1802_s29 = sld [smem:[%s2135_s0 + %s1738_s26]]   ;;  %s1744_s26 = smov 12  }
   0xc   :  { %s1807_s3 = sld [smem:[%s2135_s0 + %s1739_s30]]   ;;  %s1746_s7 = smov 14  }
   0xd   :  { %s1812_s8 = sld [smem:[%s2135_s0 + %s1740_s4]]   ;;  %s1748_s22 = smov 16  }
   0xe   :  { %s1817_s14 = sld [smem:[%s2135_s0 + %s1741_s10]]   ;;  %s1749_s28 = smov 17  }
   0xf   :  { %s1822_s19 = sld [smem:[%s2135_s0 + %s1742_s15]]   ;;  %s1747_s15 = smov 15  }
  0x10   :  { %s1827_s24 = sld [smem:[%s2135_s0 + %s1743_s20]]  }
  0x11   :  { %s1832_s30 = sld [smem:[%s2135_s0 + %s1744_s26]]  }
  0x12   :  { %2155 = sst [smem:[#allocation12_spill]] %s1807_s3 }
  0x13   :  { %2156 = sst [smem:[#allocation13_spill]] %s1812_s8 }
  0x14   :  { %2157 = sst [smem:[#allocation14_spill]] %s1817_s14 }
  0x15   :  { %2158 = sst [smem:[#allocation15_spill]] %s1822_s19 }
  0x16   :  { %s1837_s6 = sld [smem:[%s2135_s0 + %s1745_s1]]  }
  0x17   :  { %2159 = sst [smem:[#allocation16_spill]] %s1832_s30 }
  0x18   :  { %s1842_s12 = sld [smem:[%s2135_s0 + %s1746_s7]]   ;;  %s1750_s7 = smov 18  }
  0x19   :  { %s1847_s20 = sld [smem:[%s2135_s0 + %s1747_s15]]   ;;  %s1751_s15 = smov 19  }
  0x1a   :  { %s1852_s27 = sld [smem:[%s2135_s0 + %s1748_s22]]   ;;  %s1752_s22 = smov 20  }
  0x1b   :  { %s1857_s4 = sld [smem:[%s2135_s0 + %s1749_s28]]   ;;  %s1753_s28 = smov 21  }
  0x1c   :  { %2160 = sst [smem:[#allocation17_spill]] %s1837_s6 }
  0x1d   :  { %s1867_s30 = sld [smem:[%s2135_s0 + %s1751_s15]]   ;;  %s1755_s15 = smov 23  }
  0x1e   :  { %2161 = sst [smem:[#allocation18_spill]] %s1842_s12 }
  0x1f   :  { %s1862_s12 = sld [smem:[%s2135_s0 + %s1750_s7]]   ;;  %s1754_s7 = smov 22  }
  0x20   :  { %2162 = sst [smem:[#allocation19_spill]] %s1852_s27 }
  0x21   :  { %2163 = sst [smem:[#allocation20_spill]] %s1857_s4 }
  0x22   :  { %s1872_s27 = sld [smem:[%s2135_s0 + %s1752_s22]]   ;;  %s1756_s22 = smov 24  }
  0x23   :  { %2165 = sst [smem:[#allocation22_spill]] %s1867_s30 }
  0x24   :  { %s1877_s4 = sld [smem:[%s2135_s0 + %s1753_s28]]   ;;  %s1757_s28 = smov 25  }
  0x25   :  { %2164 = sst [smem:[#allocation21_spill]] %s1862_s12 }
  0x26   :  { %s1882_s12 = sld [smem:[%s2135_s0 + %s1754_s7]]   ;;  %s1758_s7 = smov 26  }
  0x27   :  { %s1887_s30 = sld [smem:[%s2135_s0 + %s1755_s15]]   ;;  %s1759_s15 = smov 27  }
  0x28   :  { %2166 = sst [smem:[#allocation23_spill]] %s1872_s27 }
  0x29   :  { %s1892_s27 = sld [smem:[%s2135_s0 + %s1756_s22]]   ;;  %s1760_s22 = smov 28  }
  0x2a   :  { %2167 = sst [smem:[#allocation24_spill]] %s1877_s4 }
  0x2b   :  { %s1897_s4 = sld [smem:[%s2135_s0 + %s1757_s28]]   ;;  %s1761_s28 = smov 29  }
  0x2c   :  { %2168 = sst [smem:[#allocation25_spill]] %s1882_s12 }
  0x2d   :  { %2169 = sst [smem:[#allocation26_spill]] %s1887_s30 }
  0x2e   :  { %s1902_s12 = sld [smem:[%s2135_s0 + %s1758_s7]]   ;;  %s1762_s7 = smov 30  }
  0x2f   :  { %2170 = sst [smem:[#allocation27_spill]] %s1892_s27 }
  0x30   :  { %s1907_s30 = sld [smem:[%s2135_s0 + %s1759_s15]]  }
  0x31   :  { %2171 = sst [smem:[#allocation28_spill]] %s1897_s4 }
  0x32   :  { %s1912_s27 = sld [smem:[%s2135_s0 + %s1760_s22]]  }
  0x33   :  { %s1917_s4 = sld [smem:[%s2135_s0 + %s1761_s28]]  }
  0x34   :  { %2172 = sst [smem:[#allocation29_spill]] %s1902_s12 }
  0x35   :  { %s1922_s12 = sld [smem:[%s2135_s0 + %s1762_s7]]  }
  0x3b   :  { %2173 = sst [smem:[#allocation30_spill]] %s1922_s12 }
  0x3c   :  { %67 = vsyncpa [#allocation3], 0 }
  0x3d   :  { %69 = vsyncpa [#allocation3 + $0x1], 0 }
  0x3e   :  { %70 = vsyncpa [#allocation5], 0 }
  0x3f   :  { %72 = vsyncpa [#allocation5 + $0x1], 0  ;;  %s1924_s15 = smov 0   ;;  %s1926_s16 = smov 0  }
  0x40   :  { %s1928_s18 = smov 0   ;;  %s1930_s22 = smov 0  }
  0x41 LB: > { %s2174_s12 = sld [smem:[#allocation30_spill]]  ;;  %s1945_s0 = sadd.s32 4294967295, %s1731_s22   ;;  %s1723_s16 = sphi %s1926_s16, %s2201_s16   ;;  %s1719_s15 = sphi %s1924_s15, %s2200_s15   ;;  %s1731_s22 = sphi %s1930_s22, %s2203_s22   ;;  %s1727_s18 = sphi %s1928_s18, %s2202_s18  }
  0x42   : > { %s2175_s17 = sld [smem:[#allocation11_spill]]  ;;  %s1521_s23 = sadd.s32 4294967294, %s1731_s22  }
  0x43   : > { %s2176_s14 = sld [smem:[#allocation14_spill]]  ;;  %s1949_s26 = sadd.s32 1, %s1731_s22  }
  0x44   : > { %s2177_s9 = sld [smem:[#allocation9_spill]]  ;;  %s699_s28 = sadd.s32 1, %s1727_s18 }
  0x45   : > { %s2178_s6 = sld [smem:[#allocation17_spill]]  ;;  %s696_s1 = ssub.s32 %s1731_s22, %s1949_s26 }
  0x46   : > { %s2179_s3 = sld [smem:[#allocation12_spill]]  ;;  %p709_p0 = scmp.ne.s32.totalorder %s1727_s18, %s1723_s16 }
  0x47   : > { %p697_p1 = scmp.eq.s32.totalorder %s696_s1, 0  ;;  %p710_p2 = scmp.eq.s32.totalorder %s1945_s0, 3 }
  0x48   : > { %p715_p3 = scmp.ne.s32.totalorder %s1723_s16, %s1719_s15  ;;  %p716_p4 = scmp.eq.s32.totalorder %s1521_s23, 3 }
  0x49   : > { %s1960_s2 = scalar_select %p697_p1, %s1727_s18, %s699_s28  }
  0x4a   : > { %p1962_p5 = por %p710_p2, %p709_p0  ;;  %p1966_p6 = por %p716_p4, %p715_p3 }
  0x4b   : > { %p1524_p7 = scmp.ge.s32.totalorder %s1731_s22, 1  ;;  %p851_p8 = scmp.lt.s32.totalorder %s1731_s22, 5 }
  0x4d   : > { %p852_p9 = pnand %p1524_p7, %p851_p8 }
  0x4e   : > { %s2182_s5 = sld [smem:[#allocation8_spill]] (!%p852_p9)  ;;  %p933_p10 = scmp.lt.s32.totalorder (!%p852_p9), %s1945_s0, 3 }
  0x4f   : > { %855 = sbr.rel (%p852_p9) target bundleno = 1986 (0x7c2), region = 136  ;;  %s2183_s13 = sld [smem:[#allocation10_spill]] (!%p852_p9) }
  0x50   : > { %s2184_s8 = sld [smem:[#allocation13_spill]] (!%p852_p9) }
  0x51   : > { %s2185_s19 = sld [smem:[#allocation15_spill]] (!%p852_p9) }
  0x52   : > { %s2186_s1 = sld [smem:[#allocation16_spill]] (!%p852_p9) }
  0x54   : > { %v942_v0 = vld [vmem:[%s2177_s9 + $0x10] sm:$0xff]  ;;  %v943_v1 = vld [vmem:[%s2177_s9 + $0x18] sm:$0xff]  ;;  %v940_v2 = vld [vmem:[%s2177_s9] sm:$0xff]  ;;  %s934_s11 = scalar_select %p933_p10, %s1945_s0, 3  ;;  %vm950_vm0 = vcmask 261120   ;;  %vm987_vm2 = vcmask 523264  }
  0x55   : > { %v945_v3 = vpack.c.bf16 %v943_v1, %v942_v0  ;;  %v941_v4 = vld [vmem:[%s2177_s9 + $0x8] sm:$0xff]  ;;  %v977_v5 = vld [vmem:[%s2175_s17 + $0x30] sm:$0xff]  ;;  %v978_v6 = vld [vmem:[%s2175_s17 + $0x38] sm:$0xff]  ;;  %vm1042_vm4 = vcmask 130048  }
  0x56   : > { %v982_v7 = vpack.c.bf16 %v978_v6, %v977_v5  ;;  %v975_v8 = vld [vmem:[%s2175_s17 + $0x20] sm:$0xff]  ;;  %v976_v9 = vld [vmem:[%s2175_s17 + $0x28] sm:$0xff]  ;;  %v944_v10 = vpack.c.bf16 %v941_v4, %v940_v2  ;;  %s1527_s23 = sshll.u32 %s934_s11, 3  ;;  %v973_v14 = vld [vmem:[%s2175_s17 + $0x10] sm:$0xff]  ;;  %s2187_s11 = sld [smem:[#allocation20_spill]] }
  0x57   : > { %960 = vmatpush.bf16.msra.mxu0 %v945_v3  ;;  %v981_v11 = vpack.c.bf16 %v976_v9, %v975_v8  ;;  %s936_s28 = scalar_lea.vmem %s2182_s5, %s1527_s23  ;;  %v974_v15 = vld [vmem:[%s2175_s17 + $0x18] sm:$0xff]  ;;  %v971_v17 = vld [vmem:[%s2175_s17] sm:$0xff]  ;;  %v972_v18 = vld [vmem:[%s2175_s17 + $0x8] sm:$0xff]  ;;  %s2188_s23 = sld [smem:[#allocation18_spill]] }
  0x58   : > { %995 = vmatpush.bf16.msra.mxu1 %v982_v7  ;;  %v1983_v12 = vld [vmem:[%s936_s28] sm:$0xff]  ;;  %v980_v16 = vpack.c.bf16 %v974_v15, %v973_v14  ;;  %v979_v19 = vpack.c.bf16 %v972_v18, %v971_v17  ;;  %v1010_v27 = vld [vmem:[%s1797_s25 + $0x10] sm:$0xff]  ;;  %v1011_v28 = vld [vmem:[%s1797_s25 + $0x18] sm:$0xff]  ;;  %s2189_s28 = sld [smem:[#allocation22_spill]]  ;;  %s1657_s17 = scalar_lea.hbm %s2174_s12, 32 }
  0x59   : > { %v939_v13 = vpack.c.bf16 %v1983_v12, %v1983_v12  ;;  %v1623_v20 = vld [vmem:[%s2183_s13] ss:$0 sm:$0xff]  ;;  %v1013_v29 = vpack.c.bf16 %v1011_v28, %v1010_v27  ;;  %v1009_v31 = vld [vmem:[%s1797_s25 + $0x8] sm:$0xff]  ;;  %v1063_v43 = vld [vmem:[%s2176_s14 + $0x10] sm:$0xff]  ;;  %s2193_s5 = sld [smem:[#allocation26_spill]] }
  0x5a   : > { %v1008_v30 = vld [vmem:[%s1797_s25] sm:$0xff]  ;;  %v1036_v41 = vld [vmem:[%s2179_s3 + $0x8] sm:$0xff]  ;;  %v1064_v44 = vld [vmem:[%s2176_s14 + $0x18] sm:$0xff] }
  0x5b   : > { %961 = vmatpush.bf16.msra.mxu0 %v944_v10  ;;  %1027 = vmatpush.bf16.msra.mxu2 %v1013_v29  ;;  %v1012_v32 = vpack.c.bf16 %v1009_v31, %v1008_v30  ;;  %v1624_v33 = vld [vmem:[%s1792_s21] ss:$0 sm:$0xff]  ;;  %v1066_v46 = vpack.c.bf16 %v1064_v44, %v1063_v43  ;;  %v1062_v47 = vld [vmem:[%s2176_s14 + $0x8] sm:$0xff]  ;;  %v1095_v54 = vld [vmem:[%s1827_s24 + $0x30] sm:$0xff] }
  0x5c   : > { %996 = vmatpush.bf16.msra.mxu1 %v981_v11  ;;  %v1035_v40 = vld [vmem:[%s2179_s3] sm:$0xff]  ;;  %v1096_v55 = vld [vmem:[%s1827_s24 + $0x38] sm:$0xff]  ;;  %v1094_v58 = vld [vmem:[%s1827_s24 + $0x28] sm:$0xff]  ;;  %s2191_s3 = sld [smem:[#allocation21_spill]] }
  0x5d   : > { %v1037_v42 = vpack.c.bf16 %v1036_v41, %v1035_v40  ;;  %v1061_v45 = vld [vmem:[%s2176_s14] sm:$0xff]  ;;  %v1100_v57 = vpack.c.bf16 %v1096_v55, %v1095_v54  ;;  %v1091_v60 = vld [vmem:[%s1827_s24 + $0x10] sm:$0xff]  ;;  %v1092_v61 = vld [vmem:[%s1827_s24 + $0x18] sm:$0xff] }
  0x5e   : > { %1528 = vmatmul.msk.bf16.vlgmr.msra.gmra.mxu0 %vm950_vm0, %v939_v13  ;;  %v1065_v48 = vpack.c.bf16 %v1062_v47, %v1061_v45  ;;  %v1625_v49 = vld [vmem:[%s1802_s29] ss:$0 sm:$0xff]  ;;  %v1098_v62 = vpack.c.bf16 %v1092_v61, %v1091_v60  ;;  %v1090_v6 = vld [vmem:[%s1827_s24 + $0x8] sm:$0xff]  ;;  %v1125_v8 = vld [vmem:[%s2178_s6 + $0x10] sm:$0xff] }
  0x5f   : > { %1028 = vmatpush.bf16.msra.mxu2 %v1012_v32  ;;  %1053 = vmatpush.bf16.msra.mxu3 %v1037_v42  ;;  %v1093_v56 = vld [vmem:[%s1827_s24 + $0x20] sm:$0xff]  ;;  %v1126_v9 = vld [vmem:[%s2178_s6 + $0x18] sm:$0xff]  ;;  %v1124_v13 = vld [vmem:[%s2178_s6 + $0x8] sm:$0xff] }
  0x60   : > { %997 = vmatpush.bf16.msra.mxu1 %v980_v16  ;;  %1112 = vmatpush.bf16.msrb.mxu0 %v1100_v57  ;;  %v1099_v59 = vpack.c.bf16 %v1094_v58, %v1093_v56  ;;  %v1626_v63 = vld [vmem:[%s2184_s8] ss:$0 sm:$0xff]  ;;  %v1128_v11 = vpack.c.bf16 %v1126_v9, %v1125_v8  ;;  %v1275_v9 = vld [vmem:[%s2193_s5 + $0x30] sm:$0xff]  ;;  %s2195_s8 = sld [smem:[#allocation28_spill]] }
  0x61   : > { %v1089_v5 = vld [vmem:[%s1827_s24] sm:$0xff] }
  0x62   : > { %v1097_v7 = vpack.c.bf16 %v1090_v6, %v1089_v5  ;;  %v1123_v10 = vld [vmem:[%s2178_s6] sm:$0xff] }
  0x63   : > { %1080 = vmatpush.bf16.msrb.mxu3 %v1066_v46  ;;  %1142 = vmatpush.bf16.msrb.mxu2 %v1128_v11  ;;  %v1127_v14 = vpack.c.bf16 %v1124_v13, %v1123_v10  ;;  %v1627_v15 = vld [vmem:[%s2185_s19] ss:$0 sm:$0xff]  ;;  %v1276_v10 = vld [vmem:[%s2193_s5 + $0x38] sm:$0xff] }
  0x64   : > { %998 = vmatpush.bf16.msra.mxu1 %v979_v19  ;;  %1113 = vmatpush.bf16.msrb.mxu0 %v1099_v59  ;;  %v1628_v27 = vld [vmem:[%s2186_s1] ss:$0 sm:$0xff]  ;;  %s2190_s1 = sld [smem:[#allocation19_spill]]  ;;  %v1280_v13 = vpack.c.bf16 %v1276_v10, %v1275_v9 }
  0x65   : > { %v1629_v41 = vld [vmem:[%s2188_s23] ss:$0 sm:$0xff]  ;;  %s2192_s23 = sld [smem:[#allocation24_spill]] }
  0x66   : > { %v1273_v11 = vld [vmem:[%s2193_s5 + $0x20] sm:$0xff] }
  0x67   : > { %1081 = vmatpush.bf16.msrb.mxu3 %v1065_v48  ;;  %1143 = vmatpush.bf16.msrb.mxu2 %v1127_v14  ;;  %v1189_v48 = vld [vmem:[%s2187_s11] sm:$0xff]  ;;  %v1274_v14 = vld [vmem:[%s2193_s5 + $0x28] sm:$0xff] }
  0x68   : > { %1114 = vmatpush.bf16.msrb.mxu0 %v1098_v62  ;;  %v1631_v62 = vld [vmem:[%s2191_s3] ss:$0 sm:$0xff]  ;;  %s2194_s3 = sld [smem:[#allocation23_spill]] }
  0x6a   : > { %v1630_v55 = vld [vmem:[%s2190_s1] ss:$0 sm:$0xff]  ;;  %s1763_s1 = smov 16  }
  0x6b   : > { %v1241_v5 = vld [vmem:[%s2192_s23] sm:$0xff] }
  0x6c   : > { %1115 = vmatpush.bf16.msrb.mxu0 %v1097_v7  ;;  %v1242_v7 = vld [vmem:[%s2192_s23 + $0x8] sm:$0xff] }
  0x6d   : > { %v1245_v8 = vpack.c.bf16 %v1242_v7, %v1241_v5 }
  0xdb   : > { %v963_v21 = vpop.f32.mrf.mxu0 }
  0xdc   : > { %v964_v22 = vadd.f32 %v1623_v20, %v963_v21  ;;  %v1159_v21 = vld [vmem:[%s1847_s20 + $0x30] sm:$0xff] }
  0xde   : > { %vm967_vm1 = vcmp.ge.f32.partialorder %v964_v22, 0.0  ;;  %v968_v23 = vmul.f32 0.01, %v964_v22 }
  0xe0   : > { %v969_v24 = vsel %vm967_vm1, %v964_v22, %v968_v23  ;;  %v1160_v22 = vld [vmem:[%s1847_s20 + $0x38] sm:$0xff]  ;;  %v1157_v23 = vld [vmem:[%s1847_s20 + $0x20] sm:$0xff] }
  0xe1   : > { %v970_v25 = vpack.c.bf16 %v969_v24, %v969_v24  ;;  %v1164_v24 = vpack.c.bf16 %v1160_v22, %v1159_v21  ;;  %v1632_v21 = vld [vmem:[%s2194_s3] ss:$0 sm:$0xff]  ;;  %s2197_s3 = sld [smem:[#allocation27_spill]] }
  0xe3   : > { %v965_v26 = vpop.f32.mrf.mxu0  ;;  %1529 = vmatmul.msk.bf16.vlgmr.msra.gmra.mxu1 %vm987_vm2, %v970_v25  ;;  %v1158_v25 = vld [vmem:[%s1847_s20 + $0x28] sm:$0xff] }
  0xe4   : > { %1176 = vmatpush.bf16.msrb.mxu1 %v1164_v24  ;;  %v1163_v26 = vpack.c.bf16 %v1158_v25, %v1157_v23 }
  0xe8   : > { %1177 = vmatpush.bf16.msrb.mxu1 %v1163_v26 }
 0x160   : > { %v1000_v34 = vpop.f32.mrf.mxu1 }
 0x161   : > { %v1001_v35 = vadd.f32 %v1624_v33, %v1000_v34  ;;  %v1155_v33 = vld [vmem:[%s1847_s20 + $0x10] sm:$0xff]  ;;  %v1156_v34 = vld [vmem:[%s1847_s20 + $0x18] sm:$0xff] }
 0x163   : > { %vm1004_vm3 = vcmp.ge.f32.partialorder %v1001_v35, 0.0  ;;  %v1005_v36 = vmul.f32 0.01, %v1001_v35 }
 0x165   : > { %v1006_v37 = vsel %vm1004_vm3, %v1001_v35, %v1005_v36  ;;  %v1162_v35 = vpack.c.bf16 %v1156_v34, %v1155_v33  ;;  %v1153_v36 = vld [vmem:[%s1847_s20] sm:$0xff]  ;;  %v1310_v34 = vld [vmem:[%s2195_s8 + $0x8] sm:$0xff] }
 0x166   : > { %v1007_v38 = vpack.c.bf16 %v1006_v37, %v1006_v37  ;;  %v1154_v37 = vld [vmem:[%s1847_s20 + $0x8] sm:$0xff] }
 0x167   : > { %1178 = vmatpush.bf16.msrb.mxu1 %v1162_v35 }
 0x168   : > { %v1002_v39 = vpop.f32.mrf.mxu1  ;;  %1530 = vmatmul.msk.bf16.vlgmr.msra.gmra.mxu2 %vm950_vm0, %v1007_v38  ;;  %v1161_v38 = vpack.c.bf16 %v1154_v37, %v1153_v36 }
 0x169   : > { %v1191_v39 = vld [vmem:[%s2187_s11 + $0x10] sm:$0xff] }
 0x16b   : > { %1179 = vmatpush.bf16.msrb.mxu1 %v1161_v38 }
 0x16f   : > { %1292 = vmatpush.bf16.msra.mxu1 %v1280_v13 }
 0x1eb   : > { %v1030_v50 = vpop.f32.mrf.mxu2 }
 0x1ec   : > { %v2007_v51 = vadd.f32 %v1625_v49, %v1030_v50  ;;  %v1190_v49 = vld [vmem:[%s2187_s11 + $0x8] sm:$0xff] }
 0x1ed   : > { %v1193_v50 = vpack.c.bf16 %v1190_v49, %v1189_v48 }
 0x1ee   : > { %v1034_v52 = vpack.c.bf16 %v2007_v51, %v2007_v51 }
 0x1f0   : > { %1531 = vmatmul.msk.bf16.vlgmr.msra.gmra.mxu3 %vm1042_vm4, %v1034_v52  ;;  %v1216_v52 = vld [vmem:[%s2189_s28] sm:$0xff] }
 0x1f3   : > { %v1032_v53 = vpop.f32.mrf.mxu2 }
 0x1f4   : > { %v1217_v53 = vld [vmem:[%s2189_s28 + $0x8] sm:$0xff] }
 0x1f5   : > { %v1218_v54 = vpack.c.bf16 %v1217_v53, %v1216_v52 }
 0x1f7   : > { %1233 = vmatpush.bf16.msra.mxu0 %v1218_v54 }
 0x273   : > { %v1055_v0 = vpop.f32.mrf.mxu3 }
 0x274   : > { %v1056_v1 = vadd.f32 %v1626_v63, %v1055_v0 }
 0x276   : > { %v1059_v2 = vmax.f32 %v1056_v1, 0.0 }
 0x278   : > { %v1060_v3 = vpack.c.bf16 %v1059_v2, %v1059_v2 }
 0x27a   : > { %1532 = vmatmul.msk.bf16.vlgmr.msrb.gmra.mxu3 %vm950_vm0, %v1060_v3  ;;  %v1243_v3 = vld [vmem:[%s2192_s23 + $0x10] sm:$0xff] }
 0x27b   : > { %v1057_v4 = vpop.f32.mrf.mxu3 }
 0x27c   : > { %v1244_v4 = vld [vmem:[%s2192_s23 + $0x18] sm:$0xff] }
 0x27d   : > { %v1246_v6 = vpack.c.bf16 %v1244_v4, %v1243_v3 }
 0x27f   : > { %1260 = vmatpush.bf16.msra.mxu2 %v1246_v6 }
 0x283   : > { %1261 = vmatpush.bf16.msra.mxu2 %v1245_v8 }
 0x2fd   : > { %v1083_v16 = vpop.f32.mrf.mxu3 }
 0x2fe   : > { %v1084_v17 = vadd.f32 %v1627_v15, %v1083_v16  ;;  %v1279_v15 = vpack.c.bf16 %v1274_v14, %v1273_v11  ;;  %v1271_v16 = vld [vmem:[%s2193_s5 + $0x10] sm:$0xff] }
 0x300   : > { %v1087_v18 = vmax.f32 %v1084_v17, 0.0  ;;  %v1272_v17 = vld [vmem:[%s2193_s5 + $0x18] sm:$0xff]  ;;  %1293 = vmatpush.bf16.msra.mxu1 %v1279_v15 }
 0x302   : > { %v1088_v19 = vpack.c.bf16 %v1087_v18, %v1087_v18  ;;  %v1278_v18 = vpack.c.bf16 %v1272_v17, %v1271_v16 }
 0x304   : > { %1533 = vmatmul.msk.bf16.vlgmr.msrb.gmra.mxu0 %vm987_vm2, %v1088_v19  ;;  %1294 = vmatpush.bf16.msra.mxu1 %v1278_v18 }
 0x305   : > { %v1085_v20 = vpop.f32.mrf.mxu3 }
 0x381   : > { %v1117_v28 = vpop.f32.mrf.mxu0 }
 0x382   : > { %v1118_v29 = vadd.f32 %v1628_v27, %v1117_v28  ;;  %v1269_v27 = vld [vmem:[%s2193_s5] sm:$0xff]  ;;  %v1270_v28 = vld [vmem:[%s2193_s5 + $0x8] sm:$0xff] }
 0x384   : > { %v2034_v30 = vadd.f32 %v1118_v29, %v1983_v12  ;;  %v1192_v12 = vld [vmem:[%s2187_s11 + $0x18] sm:$0xff]  ;;  %s2196_s11 = sld [smem:[#allocation25_spill]]  ;;  %v1311_v29 = vld [vmem:[%s2195_s8 + $0x10] sm:$0xff] }
 0x385   : > { %v1194_v40 = vpack.c.bf16 %v1192_v12, %v1191_v39 }
 0x386   : > { %v1122_v31 = vpack.c.bf16 %v2034_v30, %v2034_v30 }
 0x387   : > { %1208 = vmatpush.bf16.msra.mxu3 %v1194_v40 }
 0x388   : > { %1534 = vmatmul.msk.bf16.vlgmr.msrb.gmra.mxu2 %vm950_vm0, %v1122_v31  ;;  %v1312_v31 = vld [vmem:[%s2195_s8 + $0x18] sm:$0xff] }
 0x389   : > { %v1119_v32 = vpop.f32.mrf.mxu0  ;;  %v1314_v33 = vpack.c.bf16 %v1312_v31, %v1311_v29 }
 0x38a   : > { %v1309_v32 = vld [vmem:[%s2195_s8] sm:$0xff] }
 0x38b   : > { %1209 = vmatpush.bf16.msra.mxu3 %v1193_v50  ;;  %v1313_v35 = vpack.c.bf16 %v1310_v34, %v1309_v32  ;;  %v1633_v36 = vld [vmem:[%s2196_s11] ss:$0 sm:$0xff]  ;;  %s1544_s11 = sshll.u32 %s1945_s0, 3 }
 0x38f   : > { %1328 = vmatpush.bf16.msrb.mxu3 %v1314_v33 }
 0x393   : > { %1329 = vmatpush.bf16.msrb.mxu3 %v1313_v35 }
 0x40b   : > { %v1145_v42 = vpop.f32.mrf.mxu2 }
 0x40c   : > { %v1146_v43 = vadd.f32 %v1629_v41, %v1145_v42  ;;  %v1339_v41 = vld [vmem:[%s1907_s30 + $0x10] sm:$0xff]  ;;  %v1340_v42 = vld [vmem:[%s1907_s30 + $0x18] sm:$0xff] }
 0x40e   : > { %vm1149_vm5 = vcmp.ge.f32.partialorder %v1146_v43, 0.0  ;;  %v1150_v44 = vmul.f32 0.01, %v1146_v43 }
 0x410   : > { %v1151_v45 = vsel %vm1149_vm5, %v1146_v43, %v1150_v44  ;;  %v1337_v43 = vld [vmem:[%s1907_s30] sm:$0xff]  ;;  %v1342_v44 = vpack.c.bf16 %v1340_v42, %v1339_v41 }
 0x411   : > { %v1152_v46 = vpack.c.bf16 %v1151_v45, %v1151_v45  ;;  %v1338_v45 = vld [vmem:[%s1907_s30 + $0x8] sm:$0xff] }
 0x412   : > { %1356 = vmatpush.bf16.msrb.mxu0 %v1342_v44 }
 0x413   : > { %v1147_v47 = vpop.f32.mrf.mxu2  ;;  %1535 = vmatmul.msk.bf16.vlgmr.msrb.gmra.mxu1 %vm987_vm2, %v1152_v46  ;;  %v1341_v46 = vpack.c.bf16 %v1338_v45, %v1337_v43 }
 0x414   : > { %v1634_v47 = vld [vmem:[%s2197_s3] ss:$0 sm:$0xff]  ;;  %s1394_s3 = scalar_lea.hbm %s2174_s12, %s1544_s11 }
 0x415   : > { %s1398_s8 = sshll.u32 %s1394_s3, 4  ;;  %s1399_s8 = int_to_ptr.hbm [resolvable:$true] %s1398_s8 }
 0x416   : > { %1357 = vmatpush.bf16.msrb.mxu0 %v1341_v46  ;;  %s1651_s14 = sshra.s32 %s1399_s8, 4  ;;  %s1652_s14 = int_to_ptr.hbm [resolvable:$true] %s1651_s14 }
 0x417   : > { %p1658_p0 = scmp.lt.s32.totalorder %s1652_s14, %s2174_s12 }
 0x490   : > { %v1181_v56 = vpop.f32.mrf.mxu1 }
 0x491   : > { %v1182_v57 = vadd.f32 %v1630_v55, %v1181_v56 }
 0x493   : > { %vm1185_vm6 = vcmp.ge.f32.partialorder %v1182_v57, 0.0  ;;  %v1186_v58 = vmul.f32 0.01, %v1182_v57 }
 0x495   : > { %v1187_v59 = vsel %vm1185_vm6, %v1182_v57, %v1186_v58 }
 0x496   : > { %v1188_v60 = vpack.c.bf16 %v1187_v59, %v1187_v59 }
 0x498   : > { %v1183_v61 = vpop.f32.mrf.mxu1  ;;  %1536 = vmatmul.msk.bf16.vlgmr.msra.gmra.mxu3 %vm950_vm0, %v1188_v60 }
 0x51b   : > { %v1211_v63 = vpop.f32.mrf.mxu3 }
 0x51c   : > { %v1212_v0 = vadd.f32 %v1631_v62, %v1211_v63 }
 0x51e   : > { %v1215_v1 = vpack.c.bf16 %v1212_v0, %v1212_v0  ;;  %1302 = vrot.lane.b32.xlu0 %v1212_v0, %s1763_s1  ;;  %s2066_s1 = sand.u32 1, %s1723_s16  }
 0x51f   : > { %s2145_s6 = sshll.u32 %s2066_s1, 3  ;;  %s1370_s13 = scalar_lea.sflag [#allocation5], %s2066_s1 }
 0x520   : > { %1537 = vmatmul.msk.bf16.vlgmr.msra.gmra.mxu0 %vm1042_vm4, %v1215_v1  ;;  %s2073_s9 = scalar_lea.vmem [#allocation4], %s2145_s6  ;;  %s2198_s6 = sld [smem:[#allocation29_spill]] }
 0x521   : > { %s1396_s5 = sshll.u32 %s2073_s9, 4  ;;  %s1397_s5 = int_to_ptr.vmem [resolvable:$true] %s1396_s5 }
 0x523   : > { %v1213_v2 = vpop.f32.mrf.mxu3 }
 0x526   : > { %v1635_v54 = vld [vmem:[%s2198_s6] ss:$0 sm:$0xff]  ;;  %s1653_s6 = scalar_lea.hbm %s1652_s14, 8 }
 0x527   : > { %p1654_p11 = scmp.ne.s32.totalorder %s1652_s14, %s1653_s6  ;;  %p1659_p1 = scmp.lt.s32.totalorder %s1657_s17, %s1653_s6 }
 0x529   : > { %p1655_p12 = pnand %p1654_p11, %p1962_p5  ;;  %p1660_p2 = por %p1659_p1, %p1658_p0 }
 0x52b   : > { %p1656_p13 = pneg %p1655_p12 }
 0x52d   : > { %p1661_p3 = pnand %p1660_p2, %p1656_p13 }
 0x590   : > { %v1303_v19 = vpop.permute.xlu0 %1302 }
 0x591   : > { %v1305_v20 = vsel %vm1042_vm4, %v2007_v51, %v1303_v19  ;;  %v1277_v51 = vpack.c.bf16 %v1270_v28, %v1269_v27 }
 0x592   : > { %1306 = vst.msk [vmem:[%s2073_s9] sm:$0xff] %vm950_vm0, %v1305_v20 }
 0x593   : > { %1295 = vmatpush.bf16.msra.mxu1 %v1277_v51 }
 0x59d   : > { %v1235_v22 = vpop.f32.mrf.mxu0 }
 0x59e   : > { %v1236_v23 = vadd.f32 %v1632_v21, %v1235_v22 }
 0x5a0   : > { %v1239_v24 = vmax.f32 %v1236_v23, 0.0 }
 0x5a2   : > { %v1240_v25 = vpack.c.bf16 %v1239_v24, %v1239_v24 }
 0x5a4   : > { %1538 = vmatmul.msk.bf16.vlgmr.msra.gmra.mxu2 %vm950_vm0, %v1240_v25 }
 0x5a5   : > { %v1237_v26 = vpop.f32.mrf.mxu0 }
 0x627   : > { %v1263_v37 = vpop.f32.mrf.mxu2 }
 0x628   : > { %v1264_v38 = vadd.f32 %v1633_v36, %v1263_v37 }
 0x62a   : > { %v1267_v39 = vmax.f32 %v1264_v38, 0.0 }
 0x62c   : > { %v1268_v12 = vpack.c.bf16 %v1267_v39, %v1267_v39 }
 0x62e   : > { %1539 = vmatmul.msk.bf16.vlgmr.msra.gmra.mxu1 %vm987_vm2, %v1268_v12 }
 0x62f   : > { %v1265_v40 = vpop.f32.mrf.mxu2 }
 0x6ab   : > { %v1297_v48 = vpop.f32.mrf.mxu1 }
 0x6ac   : > { %v1298_v49 = vadd.f32 %v1634_v47, %v1297_v48 }
 0x6ae   : > { %v1307_v50 = vadd.f32 %v1298_v49, %v2034_v30 }
 0x6b0   : > { %v1308_v52 = vpack.c.bf16 %v1307_v50, %v1307_v50 }
 0x6b2   : > { %1540 = vmatmul.msk.bf16.vlgmr.msrb.gmra.mxu3 %vm950_vm0, %v1308_v52 }
 0x6b3   : > { %v1299_v53 = vpop.f32.mrf.mxu1 }
 0x735   : > { %v1331_v55 = vpop.f32.mrf.mxu3 }
 0x736   : > { %v1332_v56 = vadd.f32 %v1635_v54, %v1331_v55 }
 0x738   : > { %v1335_v57 = vmax.f32 %v1332_v56, 0.0 }
 0x73a   : > { %v1336_v58 = vpack.c.bf16 %v1335_v57, %v1335_v57 }
 0x73c   : > { %1541 = vmatmul.msk.bf16.vlgmr.msrb.gmra.mxu0 %vm950_vm0, %v1336_v58 }
 0x73d   : > { %v1333_v59 = vpop.f32.mrf.mxu3 }
 0x73e   : > { %1664 = shalt.err (!%p1661_p3)
}
 0x73f   : > { %1549 = dma.vmem_to_hbm [thread:$0]  (%p1962_p5), %s1397_s5, 128, %s1399_s8, %s1370_s13   ;;  %v1636_v30 = vld [vmem:[%s1912_s27] ss:$0 sm:$0xff] }
 0x740   : > { %s1380_s9 = scalar_lea.hbm %s1917_s4, %s1544_s11  ;;  %s2199_s0 = sshll.u32 %s2066_s1, 3 }
 0x741   : > { %s925_s3 = scalar_lea.vmem [#allocation2], %s2199_s0  ;;  %s1384_s14 = sshll.u32 %s1380_s9, 4  ;;  %s1385_s14 = int_to_ptr.hbm [resolvable:$true] %s1384_s14 }
 0x742   : > { %s1382_s19 = sshll.u32 %s925_s3, 4  ;;  %s1365_s17 = scalar_lea.sflag [#allocation3], %s2066_s1  ;;  %s1383_s19 = int_to_ptr.vmem [resolvable:$true] %s1382_s19 }
 0x743   : > { %s1679_s6 = sshra.s32 %s1385_s14, 4  ;;  %s1685_s5 = scalar_lea.hbm %s1917_s4, 32  ;;  %s1680_s6 = int_to_ptr.hbm [resolvable:$true] %s1679_s6 }
 0x744   : > { %s1681_s12 = scalar_lea.hbm %s1680_s6, 8  ;;  %p1686_p9 = scmp.lt.s32.totalorder %s1680_s6, %s1917_s4 }
 0x745   : > { %p1682_p4 = scmp.ne.s32.totalorder %s1680_s6, %s1681_s12  ;;  %p1687_p10 = scmp.lt.s32.totalorder %s1685_s5, %s1681_s12 }
 0x747   : > { %p1683_p7 = pnand %p1682_p4, %p1962_p5  ;;  %p1688_p11 = por %p1687_p10, %p1686_p9 }
 0x749   : > { %p1684_p8 = pneg %p1683_p7 }
 0x74b   : > { %p1689_p12 = pnand %p1688_p11, %p1684_p8 }
 0x7b9   : > { %v1359_v60 = vpop.f32.mrf.mxu0 }
 0x7ba   : > { %v1360_v61 = vadd.f32 %v1636_v30, %v1359_v60 }
 0x7bc   : > { %1363 = vst.msk [vmem:[%s925_s3] sm:$0xff] %vm950_vm0, %v1360_v61 }
 0x7bd   : > { %1692 = shalt.err (!%p1689_p12)
}
 0x7be   : > { %1548 = dma.vmem_to_hbm [thread:$0]  (%p1962_p5), %s1383_s19, 128, %s1385_s14, %s1365_s17  }
 0x7c1   : > { %v1361_v62 = vpop.f32.mrf.mxu0 }
 0x7c2 PF: > { %p1559_p13 = scmp.ge.s32.totalorder %s1731_s22, 2  ;;  %s1410_s13 = sand.u32 1, %s1719_s15  }
 0x7c3   : > { %s1411_s8 = scalar_lea.sflag [#allocation3], %s1410_s13 }
 0x7c4   : > { %p1553_p0 = pnand %p1559_p13, %p1966_p6 }
 0x7c6   : > { %p1554_p1 = pneg %p1553_p0 }
 0x7c8   : > { %1710 = dma.done.wait (%p1554_p1), %s1411_s8, 128  }
 0x7c9   : > { %1712 = vsyncadd (%p1554_p1), %s1411_s8, 4294967168  ;;  %s1421_s12 = scalar_lea.sflag [#allocation5], %s1410_s13 }
 0x7ca   : > { %1714 = dma.done.wait (%p1554_p1), %s1421_s12, 128  }
 0x7cb   : > { %1716 = vsyncadd (%p1554_p1), %s1421_s12, 4294967168  ;;  %p75_p5 = scmp.ge.s32.totalorder %s1949_s26, 6   ;;  %s2200_s15 = smov %s1723_s16 }
 0x7cc   : > { %s2201_s16 = smov %s1727_s18  ;;  %s2202_s18 = smov %s1960_s2 }
 0x7cd   : > { %s2203_s22 = smov %s1949_s26  ;;  %77 = sbr.rel (!%p75_p5) target bundleno = 65 (0x41), region = 218 }
 0x7d2   :  { %1427 = vsyncpa [#allocation3], 1 }
 0x7d3   :  { %1429 = vsyncpa [#allocation3 + $0x1], 1 }
 0x7d4   :  { %1430 = vsyncpa [#allocation5], 1 }
 0x7d5   :  { %1432 = vsyncpa [#allocation5 + $0x1], 1 }

</bundles_post_ra>
